<compile_context>
chip_gen: v5e
topology: v5e:2x2
jax: 0.10.0
libtpu: 0.0.40
codegen_flags: <defaults>
</compile_context>

<pallas_src>
import jax
import jax.numpy as jnp
from jax.experimental import pallas as pl
from jax.experimental.pallas import tpu as pltpu


_EPS_NORM_SQ = 1e-24          # (F.normalize default eps)^2, still a normal f32
_ONE_MINUS_EPS = 1.0 - 1e-5   # epsilon from the PyTorch forward()


def _round_up(x: int, m: int) -> int:
    return (x + m - 1) // m * m


# ---------------------------------------------------------------------------
# Pass 1: row-tiled L2 normalization (f32 math, bf16 output)
# ---------------------------------------------------------------------------
def _normalize_kernel(x_ref, o_ref):
    x = x_ref[...]
    sq = jnp.sum(x * x, axis=-1, keepdims=True)
    # x / max(||x||, eps) == x * rsqrt(max(||x||^2, eps^2))  (EUP, no divide)
    o_ref[...] = (x * jax.lax.rsqrt(jnp.maximum(sq, _EPS_NORM_SQ))).astype(o_ref.dtype)


# ---------------------------------------------------------------------------
# Pass 2: triangular tiled similarity + fused masked reduction
# ---------------------------------------------------------------------------
def _make_sim_loss_kernel(margin: float, tm: int, tn: int):
    margin = float(margin)          # Python float -> jaxpr literal (no consts)

    def kernel(it_ref, jt_ref, xr_ref, xc_ref, lr_ref, lc_ref, out_ref):
        t = pl.program_id(0)

        @pl.when(t == 0)
        def _():
            out_ref[...] = jnp.zeros_like(out_ref)

        i_blk = it_ref[t]                       # SMEM scalar reads
        j_blk = jt_ref[t]
        is_diag = i_blk == j_blk

        # Gram tile on the MXU: bf16 operands, f32 accumulation; contract the
        # feature axis of both operands (no in-kernel transpose).
        sim = jax.lax.dot_general(
            xr_ref[...], xc_ref[...],
            dimension_numbers=(((1,), (1,)), ((), ())),
            preferred_element_type=jnp.float32)                 # (tm, tn)

        label_eq = lr_ref[...] == lc_ref[...]                   # (tm,1)==(1,tn)

        # Explicit self-pair exclusion on diagonal tiles (also removes the
        # padded rows' self-pairs introduced by sentinel-label padding).
        row_i = jax.lax.broadcasted_iota(jnp.int32, (tm, tn), 0)
        col_i = jax.lax.broadcasted_iota(jnp.int32, (tm, tn), 1)
        off_diag = jnp.logical_or(jnp.logical_not(is_diag), row_i != col_i)

        contrib = jnp.where(
            label_eq,
            jnp.where((sim < _ONE_MINUS_EPS) & off_diag, 1.0 - sim, 0.0),
            jnp.where(sim > margin, sim, 0.0))

        # Symmetry: off-diagonal tiles stand for (i,j) and (j,i).
        scale = jnp.where(is_diag, 1.0, 2.0)
        # Sublane-only reduce into a lane-dense (1, tn) resident accumulator.
        out_ref[...] += scale * jnp.sum(contrib, axis=0, keepdims=True)

    return kernel


# ---------------------------------------------------------------------------
# Wrapper
# ---------------------------------------------------------------------------
def contrastive_loss_xbm(embeddings: jax.Array, labels: jax.Array,
                         margin: float = 0.5, tile: int | None = None,
                         compute_dtype=jnp.bfloat16) -> jax.Array:
    """Pallas-TPU equivalent of ContrastiveLossXBM(margin).forward.

    embeddings: (B, D) float
    labels:     (B,)   int, assumed non-negative (sentinel padding uses < 0)
    returns:    scalar float32 loss
    """
    B, D = embeddings.shape
    if tile is None:
        # Square tiles (required by the triangular decomposition); larger
        # tiles raise arithmetic intensity (~tile flop/byte with bf16 blocks).
        if B <= 256:
            tile = 128
        elif B <= 4096:
            tile = 256
        else:
            tile = 512
    tm = tn = tile

    B_pad = _round_up(max(B, tile), tile)
    D_pad = _round_up(D, 128)

    x = embeddings.astype(jnp.float32)
    if (B_pad, D_pad) != (B, D):
        x = jnp.pad(x, ((0, B_pad - B), (0, D_pad - D)))

    lab = labels.astype(jnp.int32)
    if B_pad != B:
        # Distinct negative sentinels: padded rows are zero vectors (sim = 0)
        # and never label-match a real (non-negative) label or each other, so
        # they contribute exactly 0 -> no validity mask needed in the kernel.
        sentinels = -1 - jnp.arange(B_pad - B, dtype=jnp.int32)
        lab = jnp.concatenate([lab, sentinels])
    lab_row = lab.reshape(B_pad, 1)     # reshaped in the wrapper so the kernel
    lab_col = lab.reshape(1, B_pad)     # never transposes

    gi = B_pad // tile

    # VMEM budget: cap well below v7x's 64 MiB physical VMEM.
    est_vmem = (2 * 2 * 2 * tile * D_pad * 4      # row+col blocks, 2 buffers
                + 8 * tm * tn * 4                 # sim/contrib/mask temps
                + (2 << 20))
    vmem_limit = int(min(max(est_vmem, 32 << 20), 48 << 20))

    # ---- pass 1: normalize once (mem-bound; big row blocks, bf16 out) ----
    p1_rows = tile
    while (p1_rows * 2 <= min(B_pad, 1024)
           and B_pad % (p1_rows * 2) == 0
           and p1_rows * 2 * D_pad * 4 <= (8 << 20)):
        p1_rows *= 2
    xn = pl.pallas_call(
        _normalize_kernel,
        out_shape=jax.ShapeDtypeStruct((B_pad, D_pad), compute_dtype),
        grid=(B_pad // p1_rows,),
        in_specs=[pl.BlockSpec((p1_rows, D_pad), lambda i: (i, 0))],
        out_specs=pl.BlockSpec((p1_rows, D_pad), lambda i: (i, 0)),
        compiler_params=pltpu.CompilerParams(
            dimension_semantics=("parallel",),
            vmem_limit_bytes=vmem_limit),
    )(x)

    # ---- pass 2: upper-triangular tile enumeration (i slow, j fast) ----
    steps_i, steps_j = [], []
    for i in range(gi):
        for j in range(i, gi):
            steps_i.append(i)
            steps_j.append(j)
    i_tbl = jnp.asarray(steps_i, dtype=jnp.int32)
    j_tbl = jnp.asarray(steps_j, dtype=jnp.int32)
    n_steps = len(steps_i)

    kernel = _make_sim_loss_kernel(float(margin), tm, tn)

    partials = pl.pallas_call(
        kernel,
        out_shape=jax.ShapeDtypeStruct((1, tn), jnp.float32),
        grid_spec=pltpu.PrefetchScalarGridSpec(
            num_scalar_prefetch=2,
            grid=(n_steps,),
            in_specs=[
                # Row block: index changes only when i changes -> stays resident.
                pl.BlockSpec((tm, D_pad), lambda t, it, jt: (it[t], 0)),
                # Col block: streamed per step (half the tiles thanks to symmetry).
                pl.BlockSpec((tn, D_pad), lambda t, it, jt: (jt[t], 0)),
                pl.BlockSpec((tm, 1), lambda t, it, jt: (it[t], 0)),   # row labels
                pl.BlockSpec((1, tn), lambda t, it, jt: (0, jt[t])),   # col labels
            ],
            out_specs=pl.BlockSpec((1, tn), lambda t, it, jt: (0, 0)),  # resident acc
        ),
        compiler_params=pltpu.CompilerParams(
            dimension_semantics=("arbitrary",),
            vmem_limit_bytes=vmem_limit),
    )(i_tbl, j_tbl, xn, xn, lab_row, lab_col)

    return jnp.sum(partials) / jnp.float32(B)


# ---------------------------------------------------------------------------
# References for the self-check
# ---------------------------------------------------------------------------
def _reference_loss(embeddings, labels, margin=0.5):
    """Pure-f32 mirror of the PyTorch module."""
    x = embeddings.astype(jnp.float32)
    x = x / jnp.maximum(jnp.linalg.norm(x, axis=1, keepdims=True), 1e-12)
    sim = x @ x.T
    eq = labels[:, None] == labels[None, :]
    pos = eq & (sim < 1 - 1e-5)
    neg = (~eq) & (sim > margin)
    total = jnp.sum(pos) + jnp.sum(neg)
    loss = (jnp.sum(jnp.where(pos, 1 - sim, 0.0)) +
            jnp.sum(jnp.where(neg, sim, 0.0))) / embeddings.shape[0]
    return jnp.where(total > 0, loss, 0.0)


def _bf16_reference_loss(embeddings, labels, margin=0.5, compute_dtype=jnp.bfloat16):
    """Kernel-equivalent semantics: bf16-rounded normalized embeddings, f32
    accumulation, explicit diagonal (self-pair) exclusion."""
    x = embeddings.astype(jnp.float32)
    x = x / jnp.maximum(jnp.linalg.norm(x, axis=1, keepdims=True), 1e-12)
    x = x.astype(compute_dtype).astype(jnp.float32)
    sim = x @ x.T
    eq = labels[:, None] == labels[None, :]
    not_self = ~jnp.eye(x.shape[0], dtype=bool)
    pos = eq & (sim < 1 - 1e-5) & not_self
    neg = (~eq) & (sim > margin)
    return (jnp.sum(jnp.where(pos, 1 - sim, 0.0)) +
            jnp.sum(jnp.where(neg, sim, 0.0))) / embeddings.shape[0]


if __name__ == "__main__":
    key = jax.random.PRNGKey(0)
    k1, k2, k3, k4 = jax.random.split(key, 4)

    # Test 1: tiny case (single diagonal tile, heavy row/col padding).
    B1, D1 = 8, 32
    emb1 = jax.random.normal(k1, (B1, D1), dtype=jnp.float32)
    lab1 = jax.random.randint(k2, (B1,), 0, 4, dtype=jnp.int32)
    loss1 = contrastive_loss_xbm(emb1, lab1, margin=0.5)
    jax.block_until_ready(loss1)
    ref1 = _bf16_reference_loss(emb1, lab1, margin=0.5)
    assert jnp.allclose(loss1, ref1, rtol=1e-3, atol=1e-4), (loss1, ref1)
    f32_ref1 = _reference_loss(emb1, lab1, margin=0.5)
    assert jnp.allclose(loss1, f32_ref1, rtol=0.05, atol=0.15), (loss1, f32_ref1)

    # Test 2: multi-tile triangular grid with padding (exercises the SMEM
    # (i, j) tables, the x2 off-diagonal scaling, the resident accumulator,
    # and sentinel-label padding).
    B2, D2 = 300, 40
    emb2 = jax.random.normal(k3, (B2, D2), dtype=jnp.float32)
    lab2 = jax.random.randint(k4, (B2,), 0, 7, dtype=jnp.int32)
    loss2 = contrastive_loss_xbm(emb2, lab2, margin=0.5, tile=128)
    jax.block_until_ready(loss2)
    ref2 = _bf16_reference_loss(emb2, lab2, margin=0.5)
    assert jnp.allclose(loss2, ref2, rtol=1e-3, atol=1e-3), (loss2, ref2)
    f32_ref2 = _reference_loss(emb2, lab2, margin=0.5)
    assert jnp.allclose(loss2, f32_ref2, rtol=0.02, atol=0.05), (loss2, f32_ref2)

    print("KERNEL_OK")
</pallas_src>

<mosaic_0001>
module attributes {stable_mosaic.version = 11 : i64} {
  func.func @_normalize_kernel(%arg0: i32, %arg1: memref<128x128xf32, #tpu.memory_space<vmem>>, %arg2: memref<128x128xbf16, #tpu.memory_space<vmem>>) attributes {dimension_semantics = [#tpu.dimension_semantics<parallel>], iteration_bounds = array<i64: 1>, scalar_prefetch = 0 : i64, scratch_operands = 0 : i64, tpu.core_type = #tpu.core_type<tc>, window_params = [{transform_indices = @transform_0, window_bounds = array<i64: 128, 128>}, {transform_indices = @transform_1, window_bounds = array<i64: 128, 128>}]} {
    %c0 = arith.constant 0 : index
    %c0_0 = arith.constant 0 : index
    %0 = vector.load %arg1[%c0, %c0_0] : memref<128x128xf32, #tpu.memory_space<vmem>>, vector<128x128xf32>
    %1 = arith.mulf %0, %0 : vector<128x128xf32>
    %cst = arith.constant dense<0.000000e+00> : vector<128xf32>
    %2 = vector.multi_reduction <add>, %1, %cst [1] : vector<128x128xf32> to vector<128xf32>
    %3 = vector.shape_cast %2 : vector<128xf32> to vector<128x1xf32>
    %cst_1 = arith.constant 1.000000e-24 : f32
    %4 = vector.broadcast %cst_1 : f32 to vector<128x1xf32>
    %5 = arith.maximumf %3, %4 : vector<128x1xf32>
    %6 = math.rsqrt %5 : vector<128x1xf32>
    %7 = vector.broadcast %6 : vector<128x1xf32> to vector<128x128xf32>
    %8 = arith.mulf %0, %7 : vector<128x128xf32>
    %9 = arith.truncf %8 : vector<128x128xf32> to vector<128x128xbf16>
    %c0_2 = arith.constant 0 : index
    %c0_3 = arith.constant 0 : index
    %10 = vector.load %arg2[%c0_2, %c0_3] : memref<128x128xbf16, #tpu.memory_space<vmem>>, vector<128x128xbf16>
    tpu.vector_store %arg2[%c0_2, %c0_3], %9 {strides = array<i32>} : memref<128x128xbf16, #tpu.memory_space<vmem>>, vector<128x128xbf16>,
    return
  }
  func.func @transform_0(%arg0: i32) -> (i32, i32) {
    %c0_i32 = arith.constant 0 : i32
    %c0_i32_0 = arith.constant 0 : i32
    return %arg0, %c0_i32 : i32, i32
  }
  func.func @transform_1(%arg0: i32) -> (i32, i32) {
    %c0_i32 = arith.constant 0 : i32
    %c0_i32_0 = arith.constant 0 : i32
    return %arg0, %c0_i32 : i32, i32
  }
}

</mosaic_0001>

<bundles_post_ra>
// kernel: tpu_custom_call.1
= control target key start
LH: loop header
LB: loop body
LE: loop exit
PB: predicated region body
PF: predicated region fallthrough
CT: control target
= control target key end

     0   :  { %6 = vsyncpa [#allocation3], 0  ;;  %s784_s0 = inlined_call_operand.hbm [shape: f32[128,128], index: 0, kind: input, shape index: {}]   ;;  %s785_s1 = inlined_call_operand.hbm [shape: bf16[128,128], index: 1, kind: output, shape index: {}]  }
   0x1   :  { %7 = vsyncpa [#allocation4], 0  ;;  %s12_s8 = sshll.u32 %s784_s0, 4  ;;  %s469_s9 = smov [#allocation2]   ;;  %s13_s8 = int_to_ptr.hbm [resolvable:$true] %s12_s8 }
   0x2   :  { %s14_s10 = sshll.u32 %s469_s9, 4  ;;  %s470_s11 = smov 128   ;;  %s15_s10 = int_to_ptr.vmem [resolvable:$true] %s14_s10 }
   0x3   :  { %s471_s12 = smov 8  }
   0x4   :  { %20 = dma.hbm_to_vmem [thread:$0]  %s13_s8, 2048, %s15_s10, [#allocation3], %s470_s11, %s470_s11, %s471_s12  }
   0x5   :  { %465 = dma.done.wait [#allocation3], 2048  }
   0x6   :  { %466 = vsyncadd [#allocation3], 4294965248  ;;  %v488_v0 = vld [vmem:[#allocation2 + $0x20] sm:$0xff]  ;;  %v490_v1 = vld [vmem:[#allocation2 + $0x10] sm:$0xff]  ;;  %s472_s0 = smov [#allocation5]   ;;  %s319_s16 = sshll.u32 %s785_s1, 4  ;;  %s320_s16 = int_to_ptr.hbm [resolvable:$true] %s319_s16 }
   0x7   :  { %v492_v2 = vld [vmem:[#allocation2] sm:$0xff]  ;;  %v45_v3 = vmul.f32 %v488_v0, %v488_v0  ;;  %v43_v4 = vmul.f32 %v490_v1, %v490_v1  ;;  %v500_v6 = vld [vmem:[#allocation2 + $0x28] sm:$0xff]  ;;  %v502_v7 = vld [vmem:[#allocation2 + $0x18] sm:$0xff]  ;;  %s317_s13 = sshll.u32 %s472_s0, 4  ;;  %s473_s17 = smov 64   ;;  %s318_s13 = int_to_ptr.vmem [resolvable:$true] %s317_s13 }
   0x8   :  { %v41_v5 = vmul.f32 %v492_v2, %v492_v2  ;;  %v504_v8 = vld [vmem:[#allocation2 + $0x8] sm:$0xff]  ;;  %v46_v9 = vmul.f32 %v500_v6, %v500_v6  ;;  %v44_v10 = vmul.f32 %v502_v7, %v502_v7  ;;  %v512_v12 = vld [vmem:[#allocation2 + $0x40] sm:$0xff]  ;;  %v514_v13 = vld [vmem:[#allocation2 + $0x38] sm:$0xff]  ;;  %s474_s18 = smov 4  }
   0x9   :  { %65 = vadd.xlane.f32.xlu2 %v45_v3  ;;  %61 = vadd.xlane.f32.xlu1 %v43_v4  ;;  %v42_v11 = vmul.f32 %v504_v8, %v504_v8  ;;  %v516_v14 = vld [vmem:[#allocation2 + $0x30] sm:$0xff]  ;;  %v49_v15 = vmul.f32 %v512_v12, %v512_v12  ;;  %v48_v16 = vmul.f32 %v514_v13, %v514_v13  ;;  %v524_v18 = vld [vmem:[#allocation2 + $0x58] sm:$0xff]  ;;  %v528_v20 = vld [vmem:[#allocation2 + $0x48] sm:$0xff] }
   0xa   :  { %57 = vadd.xlane.f32.xlu0 %v41_v5  ;;  %v47_v17 = vmul.f32 %v516_v14, %v516_v14  ;;  %v526_v19 = vld [vmem:[#allocation2 + $0x50] sm:$0xff]  ;;  %v52_v21 = vmul.f32 %v524_v18, %v524_v18  ;;  %v50_v23 = vmul.f32 %v528_v20, %v528_v20  ;;  %v538_v25 = vld [vmem:[#allocation2 + $0x68] sm:$0xff]  ;;  %v540_v26 = vld [vmem:[#allocation2 + $0x60] sm:$0xff] }
   0xb   :  { %v51_v22 = vmul.f32 %v526_v19, %v526_v19  ;;  %v536_v24 = vld [vmem:[#allocation2 + $0x70] sm:$0xff]  ;;  %v54_v28 = vmul.f32 %v538_v25, %v538_v25  ;;  %v53_v29 = vmul.f32 %v540_v26, %v540_v26  ;;  %v548_v30 = vld [vmem:[#allocation2 + $0x78] sm:$0xff] }
   0xc   :  { %v55_v27 = vmul.f32 %v536_v24, %v536_v24  ;;  %v56_v31 = vmul.f32 %v548_v30, %v548_v30 }
  0x11   :  { %67 = vadd.xlane.f32.xlu2 %v46_v9  ;;  %63 = vadd.xlane.f32.xlu1 %v44_v10 }
  0x12   :  { %59 = vadd.xlane.f32.xlu0 %v42_v11 }
  0x19   :  { %73 = vadd.xlane.f32.xlu2 %v49_v15  ;;  %71 = vadd.xlane.f32.xlu1 %v48_v16 }
  0x1a   :  { %69 = vadd.xlane.f32.xlu0 %v47_v17 }
  0x21   :  { %79 = vadd.xlane.f32.xlu2 %v52_v21  ;;  %77 = vadd.xlane.f32.xlu1 %v51_v22 }
  0x22   :  { %75 = vadd.xlane.f32.xlu0 %v50_v23 }
  0x29   :  { %85 = vadd.xlane.f32.xlu2 %v55_v27  ;;  %83 = vadd.xlane.f32.xlu1 %v54_v28 }
  0x2a   :  { %81 = vadd.xlane.f32.xlu0 %v53_v29 }
  0x32   :  { %87 = vadd.xlane.f32.xlu0 %v56_v31 }
  0x7c   :  { %v66_v32 = vpop.xlane.xlu2 %65  ;;  %v62_v33 = vpop.xlane.xlu1 %61 }
  0x7d   :  { %v93_v34 = vmax.f32 %v66_v32, 1e-24  ;;  %v552_v35 = vmax.f32 %v62_v33, 1e-24  ;;  %v58_v36 = vpop.xlane.xlu0 %57 }
  0x7e   :  { %v554_v37 = vmax.f32 %v58_v36, 1e-24 }
  0x7f   :  { %385 = vrsqrt.f32 %v93_v34  ;;  %vm151_vm0 = vweird.f32 %v93_v34  ;;  %vm131_vm1 = vweird.f32 %v552_v35 }
  0x80   :  { %387 = vrsqrt.f32 %v552_v35  ;;  %vm111_vm3 = vweird.f32 %v554_v37 }
  0x81   :  { %389 = vrsqrt.f32 %v554_v37 }
  0x84   :  { %v68_v38 = vpop.xlane.xlu2 %67  ;;  %v64_v39 = vpop.xlane.xlu1 %63 }
  0x85   :  { %v558_v40 = vpop.eup %385  ;;  %v560_v41 = vmax.f32 %v68_v38, 1e-24  ;;  %v562_v42 = vmax.f32 %v64_v39, 1e-24  ;;  %v60_v43 = vpop.xlane.xlu0 %59 }
  0x86   :  { %v564_v44 = vpop.eup %387  ;;  %v146_v45 = vmul.f32 %v558_v40, %v93_v34  ;;  %v567_v46 = vmax.f32 %v60_v43, 1e-24  ;;  %vm152_vm2 = vweird.f32 %v558_v40 }
  0x87   :  { %v569_v47 = vpop.eup %389  ;;  %v126_v48 = vmul.f32 %v564_v44, %v552_v35  ;;  %391 = vrsqrt.f32 %v560_v41  ;;  %vm132_vm4 = vweird.f32 %v564_v44  ;;  %vm161_vm5 = vweird.f32 %v560_v41  ;;  %vm613_vm10 = vmor %vm151_vm0, %vm152_vm2 }
  0x88   :  { %v147_v49 = vmul.f32 %v558_v40, %v146_v45  ;;  %v106_v50 = vmul.f32 %v569_v47, %v554_v37  ;;  %393 = vrsqrt.f32 %v562_v42  ;;  %vm112_vm6 = vweird.f32 %v569_v47  ;;  %vm629_vm12 = vmor %vm131_vm1, %vm132_vm4 }
  0x89   :  { %v127_v51 = vmul.f32 %v564_v44, %v126_v48  ;;  %395 = vrsqrt.f32 %v567_v46  ;;  %vm141_vm7 = vweird.f32 %v562_v42  ;;  %vm121_vm8 = vweird.f32 %v567_v46  ;;  %vm644_vm13 = vmor %vm111_vm3, %vm112_vm6 }
  0x8a   :  { %v148_v52 = vmul.f32 0.5, %v147_v49  ;;  %v107_v53 = vmul.f32 %v569_v47, %v106_v50 }
  0x8b   :  { %v128_v54 = vmul.f32 0.5, %v127_v51 }
  0x8c   :  { %v108_v55 = vmul.f32 0.5, %v107_v53  ;;  %v74_v56 = vpop.xlane.xlu2 %73  ;;  %v72_v57 = vpop.xlane.xlu1 %71  ;;  %v149_v59 = vsub.f32 1.5, %v148_v52 }
  0x8d   :  { %v581_v58 = vpop.eup %391  ;;  %v584_v60 = vmax.f32 %v74_v56, 1e-24  ;;  %v70_v61 = vpop.xlane.xlu0 %69  ;;  %v129_v63 = vsub.f32 1.5, %v128_v54  ;;  %v595_v10 = vmax.f32 %v72_v57, 1e-24 }
  0x8e   :  { %v586_v62 = vpop.eup %393  ;;  %v156_v3 = vmul.f32 %v581_v58, %v560_v41  ;;  %v109_v5 = vsub.f32 1.5, %v108_v55  ;;  %v150_v16 = vmul.f32 %v558_v40, %v149_v59  ;;  %vm162_vm9 = vweird.f32 %v581_v58 }
  0x8f   :  { %v396_v4 = vpop.eup %395  ;;  %v136_v9 = vmul.f32 %v586_v62, %v562_v42  ;;  %397 = vrsqrt.f32 %v584_v60  ;;  %v130_v21 = vmul.f32 %v564_v44, %v129_v63  ;;  %vm142_vm11 = vweird.f32 %v586_v62  ;;  %vm163_vm15 = vmor %vm161_vm5, %vm162_vm9 }
  0x90   :  { %v157_v11 = vmul.f32 %v581_v58, %v156_v3  ;;  %v116_v15 = vmul.f32 %v396_v4, %v567_v46  ;;  %v110_v27 = vmul.f32 %v569_v47, %v109_v5  ;;  %399 = vrsqrt.f32 %v595_v10  ;;  %vm143_vm0 = vmor %vm141_vm7, %vm142_vm11 }
  0x91   :  { %v137_v17 = vmul.f32 %v586_v62, %v136_v9  ;;  %v618_v33 = vmax.f32 %v70_v61, 1e-24  ;;  %v154_v43 = vsel %vm613_vm10, %v558_v40, %v150_v16  ;;  %v134_v51 = vsel %vm629_vm12, %v564_v44, %v130_v21 }
  0x92   :  { %v158_v22 = vmul.f32 0.5, %v157_v11  ;;  %v117_v23 = vmul.f32 %v396_v4, %v116_v15  ;;  %vm122_vm14 = vweird.f32 %v396_v4  ;;  %v114_v53 = vsel %vm644_vm13, %v569_v47, %v110_v27 }
  0x93   :  { %v138_v28 = vmul.f32 0.5, %v137_v17  ;;  %401 = vrsqrt.f32 %v618_v33  ;;  %v269_v54 = vmul.f32 %v154_v43, %v488_v0  ;;  %v267_v56 = vmul.f32 %v134_v51, %v490_v1  ;;  %vm123_vm1 = vmor %vm121_vm8, %vm122_vm14 }
  0x94   :  { %v159_v31 = vsub.f32 1.5, %v158_v22  ;;  %v118_v32 = vmul.f32 0.5, %v117_v23  ;;  %v80_v36 = vpop.xlane.xlu2 %79  ;;  %v78_v38 = vpop.xlane.xlu1 %77  ;;  %v265_v0 = vmul.f32 %v114_v53, %v492_v2  ;;  %vm181_vm2 = vweird.f32 %v595_v10 }
  0x95   :  { %v620_v39 = vpop.eup %397  ;;  %v139_v45 = vsub.f32 1.5, %v138_v28  ;;  %v633_v48 = vmax.f32 %v80_v36, 1e-24  ;;  %v635_v49 = vmax.f32 %v78_v38, 1e-24  ;;  %v76_v50 = vpop.xlane.xlu0 %75  ;;  %vm171_vm3 = vweird.f32 %v618_v33 }
  0x96   :  { %v160_v40 = vmul.f32 %v581_v58, %v159_v31  ;;  %v119_v52 = vsub.f32 1.5, %v118_v32  ;;  %v186_v37 = vmul.f32 %v620_v39, %v584_v60  ;;  %v667_v41 = vpop.eup %399  ;;  %vm191_vm4 = vweird.f32 %v584_v60 }
  0x97   :  { %v140_v44 = vmul.f32 %v586_v62, %v139_v45  ;;  %403 = vrsqrt.f32 %v633_v48  ;;  %v176_v61 = vmul.f32 %v667_v41, %v595_v10  ;;  %vm192_vm5 = vweird.f32 %v620_v39 }
  0x98   :  { %v164_v55 = vsel %vm163_vm15, %v581_v58, %v160_v40  ;;  %v120_v47 = vmul.f32 %v396_v4, %v119_v52  ;;  %405 = vrsqrt.f32 %v635_v49  ;;  %vm182_vm6 = vweird.f32 %v667_v41 }
  0x99   :  { %v270_v57 = vmul.f32 %v164_v55, %v500_v6  ;;  %v144_v59 = vsel %vm143_vm0, %v586_v62, %v140_v44  ;;  %v187_v6 = vmul.f32 %v620_v39, %v186_v37  ;;  %v682_v62 = vmax.f32 %v76_v50, 1e-24  ;;  %v685_v9 = vpop.eup %401  ;;  %vm714_vm9 = vmor %vm181_vm2, %vm182_vm6 }
  0x9a   :  { %v268_v42 = vmul.f32 %v144_v59, %v502_v7  ;;  %v124_v58 = vsel %vm123_vm1, %v396_v4, %v120_v47  ;;  %v177_v46 = vmul.f32 %v667_v41, %v176_v61  ;;  %v166_v15 = vmul.f32 %v685_v9, %v618_v33  ;;  %vm756_vm1 = vmor %vm191_vm4, %vm192_vm5 }
  0x9b   :  { %v345_v63 = vpack.c.bf16 %v270_v57, %v269_v54  ;;  %v266_v1 = vmul.f32 %v124_v58, %v504_v8  ;;  %407 = vrsqrt.f32 %v682_v62  ;;  %v188_v21 = vmul.f32 0.5, %v187_v6 }
  0x9c   :  { %v340_v3 = vpack.c.bf16 %v268_v42, %v267_v56  ;;  %v86_v5 = vpop.xlane.xlu2 %85  ;;  %v178_v8 = vmul.f32 0.5, %v177_v46  ;;  %v84_v16 = vpop.xlane.xlu1 %83  ;;  %v167_v27 = vmul.f32 %v685_v9, %v166_v15  ;;  %vm221_vm7 = vweird.f32 %v633_v48 }
  0x9d   :  { %373 = vst [vmem:[#allocation5 + $0x10] sm:$0xff] %v345_v63   ;;  %v335_v2 = vpack.c.bf16 %v266_v1, %v265_v0  ;;  %v688_v7 = vmax.f32 %v86_v5, 1e-24  ;;  %v82_v4 = vpop.xlane.xlu0 %81  ;;  %v404_v11 = vpop.eup %403  ;;  %vm211_vm8 = vweird.f32 %v635_v49  ;;  %v706_v31 = vmax.f32 %v84_v16, 1e-24 }
  0x9e   :  { %372 = vst [vmem:[#allocation5 + $0x8] sm:$0xff] %v340_v3   ;;  %v693_v17 = vpop.eup %405  ;;  %v216_v22 = vmul.f32 %v404_v11, %v633_v48  ;;  %v179_v23 = vsub.f32 1.5, %v178_v8  ;;  %v168_v36 = vmul.f32 0.5, %v167_v27  ;;  %v710_v43 = vmax.f32 %v82_v4, 1e-24 }
  0x9f   :  { %336 = vst [vmem:[#allocation5] sm:$0xff] %v335_v2   ;;  %409 = vrsqrt.f32 %v688_v7  ;;  %v206_v28 = vmul.f32 %v693_v17, %v635_v49  ;;  %v189_v45 = vsub.f32 1.5, %v188_v21  ;;  %vm172_vm10 = vweird.f32 %v685_v9 }
  0xa0   :  { %v217_v29 = vmul.f32 %v404_v11, %v216_v22  ;;  %v180_v32 = vmul.f32 %v667_v41, %v179_v23  ;;  %411 = vrsqrt.f32 %v706_v31  ;;  %v169_v40 = vsub.f32 1.5, %v168_v36  ;;  %vm173_vm13 = vmor %vm171_vm3, %vm172_vm10 }
  0xa1   :  { %v207_v38 = vmul.f32 %v693_v17, %v206_v28  ;;  %v408_v34 = vpop.eup %407  ;;  %vm222_vm11 = vweird.f32 %v404_v11  ;;  %vm212_vm12 = vweird.f32 %v693_v17  ;;  %413 = vrsqrt.f32 %v710_v43 }
  0xa2   :  { %v218_v51 = vmul.f32 0.5, %v217_v29  ;;  %v184_v35 = vsel %vm714_vm9, %v667_v41, %v180_v32  ;;  %v196_v53 = vmul.f32 %v408_v34, %v682_v62  ;;  %v170_v54 = vmul.f32 %v685_v9, %v169_v40  ;;  %vm223_vm14 = vmor %vm221_vm7, %vm222_vm11 }
  0xa3   :  { %v208_v52 = vmul.f32 0.5, %v207_v38  ;;  %v190_v56 = vmul.f32 %v620_v39, %v189_v45  ;;  %v272_v57 = vmul.f32 %v184_v35, %v514_v13  ;;  %vm213_vm15 = vmor %vm211_vm8, %vm212_vm12  ;;  %vm202_vm0 = vweird.f32 %v408_v34 }
  0xa4   :  { %v219_v10 = vsub.f32 1.5, %v218_v51  ;;  %v197_v47 = vmul.f32 %v408_v34, %v196_v53  ;;  %v174_v42 = vsel %vm173_vm13, %v685_v9, %v170_v54  ;;  %vm201_vm2 = vweird.f32 %v682_v62 }
  0xa5   :  { %v724_v44 = vpop.eup %409  ;;  %v88_v37 = vpop.xlane.xlu0 %87  ;;  %v209_v55 = vsub.f32 1.5, %v208_v52  ;;  %v271_v13 = vmul.f32 %v174_v42, %v516_v14  ;;  %v194_v9 = vsel %vm756_vm1, %v620_v39, %v190_v56  ;;  %vm203_vm3 = vmor %vm201_vm2, %vm202_vm0  ;;  %vm241_vm4 = vweird.f32 %v706_v31 }
  0xa6   :  { %v246_v41 = vmul.f32 %v724_v44, %v688_v7  ;;  %v220_v59 = vmul.f32 %v404_v11, %v219_v10  ;;  %v737_v0 = vmax.f32 %v88_v37, 1e-24  ;;  %v198_v61 = vmul.f32 0.5, %v197_v47  ;;  %v412_v1 = vpop.eup %411 }
  0xa7   :  { %v210_v58 = vmul.f32 %v693_v17, %v209_v55  ;;  %v414_v46 = vpop.eup %413  ;;  %v350_v5 = vpack.c.bf16 %v272_v57, %v271_v13  ;;  %vm242_vm5 = vweird.f32 %v412_v1  ;;  %vm251_vm7 = vweird.f32 %v688_v7 }
  0xa8   :  { %v247_v63 = vmul.f32 %v724_v44, %v246_v41  ;;  %v224_v6 = vsel %vm223_vm14, %v404_v11, %v220_v59  ;;  %415 = vrsqrt.f32 %v737_v0  ;;  %v199_v3 = vsub.f32 1.5, %v198_v61  ;;  %vm243_vm9 = vmor %vm241_vm4, %vm242_vm5 }
  0xa9   :  { %v276_v33 = vmul.f32 %v224_v6, %v524_v18  ;;  %v214_v48 = vsel %vm213_vm15, %v693_v17, %v210_v58  ;;  %v236_v18 = vmul.f32 %v412_v1, %v706_v31  ;;  %v226_v11 = vmul.f32 %v414_v46, %v710_v43  ;;  %374 = vst [vmem:[#allocation5 + $0x18] sm:$0xff] %v350_v5  }
  0xaa   :  { %v275_v49 = vmul.f32 %v214_v48, %v526_v19  ;;  %v200_v2 = vmul.f32 %v408_v34, %v199_v3  ;;  %v248_v4 = vmul.f32 0.5, %v247_v63  ;;  %v273_v19 = vmul.f32 %v194_v9, %v512_v12 }
  0xab   :  { %v237_v8 = vmul.f32 %v412_v1, %v236_v18  ;;  %v227_v16 = vmul.f32 %v414_v46, %v226_v11  ;;  %vm232_vm6 = vweird.f32 %v414_v46  ;;  %vm252_vm8 = vweird.f32 %v724_v44 }
  0xac   :  { %v360_v60 = vpack.c.bf16 %v276_v33, %v275_v49  ;;  %v204_v15 = vsel %vm203_vm3, %v408_v34, %v200_v2  ;;  %v249_v22 = vsub.f32 1.5, %v248_v4  ;;  %vm231_vm10 = vweird.f32 %v710_v43  ;;  %vm253_vm13 = vmor %vm251_vm7, %vm252_vm8 }
  0xad   :  { %v274_v62 = vmul.f32 %v204_v15, %v528_v20  ;;  %v238_v21 = vmul.f32 0.5, %v237_v8  ;;  %v228_v23 = vmul.f32 0.5, %v227_v16  ;;  %vm233_vm11 = vmor %vm231_vm10, %vm232_vm6  ;;  %vm261_vm14 = vweird.f32 %v737_v0 }
  0xae   :  { %v416_v17 = vpop.eup %415  ;;  %376 = vst [vmem:[#allocation5 + $0x28] sm:$0xff] %v360_v60   ;;  %v250_v20 = vmul.f32 %v724_v44, %v249_v22 }
  0xaf   :  { %v256_v39 = vmul.f32 %v416_v17, %v737_v0  ;;  %v355_v27 = vpack.c.bf16 %v274_v62, %v273_v19  ;;  %v239_v28 = vsub.f32 1.5, %v238_v21  ;;  %v229_v29 = vsub.f32 1.5, %v228_v23 }
  0xb0   :  { %vm262_vm12 = vweird.f32 %v416_v17  ;;  %v254_v51 = vsel %vm253_vm13, %v724_v44, %v250_v20 }
  0xb1   :  { %v257_v32 = vmul.f32 %v416_v17, %v256_v39  ;;  %375 = vst [vmem:[#allocation5 + $0x20] sm:$0xff] %v355_v27   ;;  %v240_v12 = vmul.f32 %v412_v1, %v239_v28  ;;  %v230_v36 = vmul.f32 %v414_v46, %v229_v29  ;;  %vm263_vm15 = vmor %vm261_vm14, %vm262_vm12  ;;  %v279_v43 = vmul.f32 %v254_v51, %v536_v24 }
  0xb3   :  { %v258_v38 = vmul.f32 0.5, %v257_v32  ;;  %v244_v34 = vsel %vm243_vm9, %v412_v1, %v240_v12  ;;  %v234_v45 = vsel %vm233_vm11, %v414_v46, %v230_v36 }
  0xb4   :  { %v278_v31 = vmul.f32 %v244_v34, %v538_v25  ;;  %v277_v7 = vmul.f32 %v234_v45, %v540_v26 }
  0xb5   :  { %v259_v50 = vsub.f32 1.5, %v258_v38 }
  0xb6   :  { %v365_v40 = vpack.c.bf16 %v278_v31, %v277_v7 }
  0xb7   :  { %v260_v35 = vmul.f32 %v416_v17, %v259_v50 }
  0xb8   :  { %377 = vst [vmem:[#allocation5 + $0x30] sm:$0xff] %v365_v40  }
  0xb9   :  { %v264_v25 = vsel %vm263_vm15, %v416_v17, %v260_v35 }
  0xba   :  { %v280_v52 = vmul.f32 %v264_v25, %v548_v30 }
  0xbc   :  { %v370_v26 = vpack.c.bf16 %v280_v52, %v279_v43 }
  0xbe   :  { %378 = vst [vmem:[#allocation5 + $0x38] sm:$0xff] %v370_v26  }
  0xbf   :  { %325 = dma.vmem_to_hbm [thread:$0]  %s318_s13, 1024, %s320_s16, [#allocation4], %s473_s17, %s473_s17, %s474_s18  }
  0xc0   :  { %467 = dma.done.wait [#allocation4], 1024  }
  0xc1   :  { %468 = vsyncadd [#allocation4], 4294966272 }
  0xc2   :  { %330 = vsyncpa [#allocation3], 1 }
  0xc3   :  { %331 = vsyncpa [#allocation4], 1 }

</bundles_post_ra>
